<compile_context>
chip_gen: v5e
topology: v5e:2x2
jax: 0.10.0
libtpu: 0.0.40
codegen_flags: <defaults>
</compile_context>

<pallas_src>
from functools import partial

import jax
import jax.numpy as jnp
from jax.experimental import pallas as pl
from jax.experimental.pallas import tpu as pltpu


def _scale_shift_kernel(g_ref, b_ref, x_ref, o_ref):
    # (rows, 1) * (rows, lanes) + (rows, 1)  -> lane broadcast on the VPU
    o_ref[...] = g_ref[...] * x_ref[...] + b_ref[...]


def _scale_kernel(g_ref, x_ref, o_ref):
    o_ref[...] = g_ref[...] * x_ref[...]


def _round_up(v, m):
    return ((v + m - 1) // m) * m


def _choose_tiles(nc, hw_pad, itemsize):
    """Pick (8,128)-aligned tiles sized by bytes (~2 MiB of x per block)."""
    # Lane tile: full (padded) width up to 2048 lanes; always a multiple of
    # 128 because hw_pad is.
    lane_tile = min(hw_pad, 2048)

    # Grow the row tile until the x block is ~2 MiB (safe on every
    # generation: 2 x-buffers + 2 out-buffers = 8 MiB < v5e's 16 MiB scoped
    # default, well under v6e/v7x budgets).
    target_bytes = 2 * 1024 * 1024
    rows_for_target = max(1, target_bytes // (lane_tile * itemsize))
    row_cap = _round_up(nc, 8)
    row_tile = min(row_cap, max(8, _round_up(rows_for_target, 8)))

    # v7x has 2 TensorCores and shards parallel grid axes across them: make
    # sure at least one axis has >= 2 blocks whenever the shape allows it.
    if pl.cdiv(nc, row_tile) == 1 and pl.cdiv(hw_pad, lane_tile) == 1:
        if row_tile >= 16:
            row_tile = _round_up(row_tile // 2, 8)
        elif lane_tile >= 256:
            lane_tile //= 2

    return row_tile, lane_tile


@partial(jax.jit, static_argnums=(3, 4))
def conditional_none_norm3d(x, y, embed_weight, num_features, bias=True):
    """x: (N, C, H, W) float32, y: (N,) int32 class ids."""
    N, C, H, W = x.shape
    assert C == num_features

    # Embedding lookup (glue, tiny gather of N rows; fused under this jit).
    emb = embed_weight[y]  # (N, 2C) if bias else (N, C)
    if bias:
        gamma, beta = emb[:, :C], emb[:, C:]
    else:
        gamma, beta = emb, None

    NC, HW = N * C, H * W
    x2 = x.reshape(NC, HW)
    g2 = gamma.reshape(NC, 1).astype(x.dtype)

    # Keep output stores lane-dense: pad the lane axis to a multiple of 128
    # when needed (no-op for the common power-of-two spatial shapes).
    HW_pad = _round_up(HW, 128)
    if HW_pad != HW:
        x2 = jnp.pad(x2, ((0, 0), (0, HW_pad - HW)))

    itemsize = jnp.dtype(x.dtype).itemsize
    row_tile, lane_tile = _choose_tiles(NC, HW_pad, itemsize)
    grid = (pl.cdiv(NC, row_tile), pl.cdiv(HW_pad, lane_tile))

    # Rows outer, columns inner; gamma/beta blocks are constant across the
    # inner loop so they are not re-fetched per column tile.
    x_spec = pl.BlockSpec((row_tile, lane_tile), lambda i, j: (i, j))
    gb_spec = pl.BlockSpec((row_tile, 1), lambda i, j: (i, 0))
    out_spec = pl.BlockSpec((row_tile, lane_tile), lambda i, j: (i, j))

    params = pltpu.CompilerParams(
        dimension_semantics=("parallel", "parallel"))

    if bias:
        b2 = beta.reshape(NC, 1).astype(x.dtype)
        out2 = pl.pallas_call(
            _scale_shift_kernel,
            out_shape=jax.ShapeDtypeStruct((NC, HW_pad), x.dtype),
            grid=grid,
            in_specs=[gb_spec, gb_spec, x_spec],
            out_specs=out_spec,
            compiler_params=params,
        )(g2, b2, x2)
    else:
        out2 = pl.pallas_call(
            _scale_kernel,
            out_shape=jax.ShapeDtypeStruct((NC, HW_pad), x.dtype),
            grid=grid,
            in_specs=[gb_spec, x_spec],
            out_specs=out_spec,
            compiler_params=params,
        )(g2, x2)

    if HW_pad != HW:
        out2 = out2[:, :HW]
    return out2.reshape(N, C, H, W)


def init_embed_weight(key, num_classes, num_features, bias=True):
    """Matches the PyTorch init: gamma half ~ U[0,1), beta half zeros."""
    if bias:
        gamma_part = jax.random.uniform(
            key, (num_classes, num_features), dtype=jnp.float32)
        beta_part = jnp.zeros((num_classes, num_features), dtype=jnp.float32)
        return jnp.concatenate([gamma_part, beta_part], axis=-1)
    else:
        return jax.random.uniform(
            key, (num_classes, num_features), dtype=jnp.float32)


if __name__ == "__main__":
    key = jax.random.PRNGKey(0)
    k_w, k_x, k_y = jax.random.split(key, 3)

    num_features = 4
    num_classes = 10
    N, C, H, W = 2, num_features, 16, 16

    embed_weight = init_embed_weight(k_w, num_classes, num_features, bias=True)
    x = jax.random.normal(k_x, (N, C, H, W), dtype=jnp.float32)
    y = jax.random.randint(k_y, (N,), 0, num_classes, dtype=jnp.int32)

    out = conditional_none_norm3d(x, y, embed_weight, num_features, bias=True)
    out = jax.block_until_ready(out)

    # Pure-JAX reference for correctness.
    emb = embed_weight[y]
    gamma_ref = emb[:, :num_features].reshape(N, C, 1, 1)
    beta_ref = emb[:, num_features:].reshape(N, C, 1, 1)
    ref = gamma_ref * x + beta_ref

    assert out.shape == (N, C, H, W)
    assert jnp.allclose(out, ref, atol=1e-6, rtol=1e-6)

    # Also exercise the bias=False path.
    embed_weight_nb = init_embed_weight(k_w, num_classes, num_features,
                                        bias=False)
    out_nb = conditional_none_norm3d(x, y, embed_weight_nb, num_features,
                                     bias=False)
    out_nb = jax.block_until_ready(out_nb)
    ref_nb = embed_weight_nb[y].reshape(N, C, 1, 1) * x
    assert jnp.allclose(out_nb, ref_nb, atol=1e-6, rtol=1e-6)

    # Exercise a non-(8,128)-aligned shape to confirm edge blocks / lane
    # padding work (previously this fell back to a single full-extent block).
    N2, C2, H2, W2 = 3, num_features, 10, 9   # NC=12 (not %8), HW=90 (not %128)
    x_odd = jax.random.normal(k_x, (N2, C2, H2, W2), dtype=jnp.float32)
    y_odd = jax.random.randint(k_y, (N2,), 0, num_classes, dtype=jnp.int32)
    out_odd = conditional_none_norm3d(x_odd, y_odd, embed_weight,
                                      num_features, bias=True)
    out_odd = jax.block_until_ready(out_odd)
    emb_odd = embed_weight[y_odd]
    ref_odd = (emb_odd[:, :num_features].reshape(N2, C2, 1, 1) * x_odd
               + emb_odd[:, num_features:].reshape(N2, C2, 1, 1))
    assert jnp.allclose(out_odd, ref_odd, atol=1e-6, rtol=1e-6)

    print("KERNEL_OK")
</pallas_src>

<mosaic_0001>
module attributes {stable_mosaic.version = 11 : i64} {
  func.func @_scale_shift_kernel(%arg0: i32, %arg1: i32, %arg2: memref<8x1xf32, #tpu.memory_space<vmem>>, %arg3: memref<8x1xf32, #tpu.memory_space<vmem>>, %arg4: memref<8x128xf32, #tpu.memory_space<vmem>>, %arg5: memref<8x128xf32, #tpu.memory_space<vmem>>) attributes {dimension_semantics = [#tpu.dimension_semantics<parallel>, #tpu.dimension_semantics<parallel>], iteration_bounds = array<i64: 1, 2>, scalar_prefetch = 0 : i64, scratch_operands = 0 : i64, tpu.core_type = #tpu.core_type<tc>, window_params = [{transform_indices = @transform_0, window_bounds = array<i64: 8, 1>}, {transform_indices = @transform_1, window_bounds = array<i64: 8, 1>}, {transform_indices = @transform_2, window_bounds = array<i64: 8, 128>}, {transform_indices = @transform_3, window_bounds = array<i64: 8, 128>}]} {
    %c0 = arith.constant 0 : index
    %c0_0 = arith.constant 0 : index
    %0 = vector.load %arg2[%c0, %c0_0] : memref<8x1xf32, #tpu.memory_space<vmem>>, vector<8x1xf32>
    %c0_1 = arith.constant 0 : index
    %c0_2 = arith.constant 0 : index
    %1 = vector.load %arg4[%c0_1, %c0_2] : memref<8x128xf32, #tpu.memory_space<vmem>>, vector<8x128xf32>
    %2 = vector.broadcast %0 : vector<8x1xf32> to vector<8x128xf32>
    %3 = arith.mulf %2, %1 : vector<8x128xf32>
    %c0_3 = arith.constant 0 : index
    %c0_4 = arith.constant 0 : index
    %4 = vector.load %arg3[%c0_3, %c0_4] : memref<8x1xf32, #tpu.memory_space<vmem>>, vector<8x1xf32>
    %5 = vector.broadcast %4 : vector<8x1xf32> to vector<8x128xf32>
    %6 = arith.addf %3, %5 : vector<8x128xf32>
    %c0_5 = arith.constant 0 : index
    %c0_6 = arith.constant 0 : index
    %7 = vector.load %arg5[%c0_5, %c0_6] : memref<8x128xf32, #tpu.memory_space<vmem>>, vector<8x128xf32>
    tpu.vector_store %arg5[%c0_5, %c0_6], %6 {strides = array<i32>} : memref<8x128xf32, #tpu.memory_space<vmem>>, vector<8x128xf32>,
    return
  }
  func.func @transform_0(%arg0: i32, %arg1: i32) -> (i32, i32) {
    %c0_i32 = arith.constant 0 : i32
    %c0_i32_0 = arith.constant 0 : i32
    return %arg0, %c0_i32 : i32, i32
  }
  func.func @transform_1(%arg0: i32, %arg1: i32) -> (i32, i32) {
    %c0_i32 = arith.constant 0 : i32
    %c0_i32_0 = arith.constant 0 : i32
    return %arg0, %c0_i32 : i32, i32
  }
  func.func @transform_2(%arg0: i32, %arg1: i32) -> (i32, i32) {
    %c0_i32 = arith.constant 0 : i32
    return %arg0, %arg1 : i32, i32
  }
  func.func @transform_3(%arg0: i32, %arg1: i32) -> (i32, i32) {
    %c0_i32 = arith.constant 0 : i32
    return %arg0, %arg1 : i32, i32
  }
}

</mosaic_0001>

<bundles_post_ra>
// kernel: conditional_none_norm3d.1
= control target key start
LH: loop header
LB: loop body
LE: loop exit
PB: predicated region body
PF: predicated region fallthrough
CT: control target
= control target key end

     0   :  { %s448_s12 = smov 0   ;;  %s450_s13 = smov 0   ;;  %s480_s0 = inlined_call_operand.vmem [shape: f32[8,1], index: 0, kind: input, shape index: {}]   ;;  %s481_s1 = inlined_call_operand.vmem [shape: f32[8,1], index: 1, kind: input, shape index: {}]   ;;  %s482_s2 = inlined_call_operand.vmem [shape: f32[8,256], index: 2, kind: input, shape index: {}]   ;;  %s483_s3 = inlined_call_operand.vmem [shape: f32[8,256], index: 3, kind: output, shape index: {}]  }
   0x1   :  { %s452_s14 = smov 0  }
   0x2 LB: > { %s22_s15 = sadd.s32 1, %s421_s13  ;;  %p372_p0 = scmp.ge.s32.totalorder %s425_s14, 1  ;;  %s425_s14 = sphi %s452_s14, %s13_s14   ;;  %s421_s13 = sphi %s450_s13, %s485_s13   ;;  %s417_s12 = sphi %s448_s12, %s484_s12  }
   0x3   : > { %p23_p1 = scmp.ge.s32.totalorder %s22_s15, 2  ;;  %p174_p2 = scmp.lt.s32.totalorder %s425_s14, 3 }
   0x5   : > { %s487_s15 = smov (%p23_p1, %s22_s15), 0  ;;  %p175_p3 = pnand %p372_p0, %p174_p2 }
   0x6   : > { %p222_p4 = scmp.lt.s32.totalorder (!%p175_p3), %s417_s12, 1 }
   0x7   : > { %178 = sbr.rel (%p175_p3) target bundleno = 140 (0x8c), region = 32 }
   0xc   : > { %v236_v0 = vld [vmem:[%s480_s0] sm:$0xff]  ;;  %v427_v1 = vmov 0   ;;  %s489_s12 = smov (!%p222_p4, %s417_s12), 1 }
   0xd   : > { %402 = vset.pattern.permute.xlu0 %v427_v1  ;;  %v244_v2 = vld [vmem:[%s481_s1] sm:$0xff]  ;;  %s373_s20 = sshll.u32 %s489_s12, 3 }
   0xe   : > { %240 = vperm.xlu0 %402, %v236_v0   ;;  %s227_s23 = scalar_lea.vmem %s482_s2, %s373_s20  ;;  %s235_s26 = scalar_lea.vmem %s483_s3, %s373_s20 }
   0xf   : > { %v237_v4 = vld [vmem:[%s227_s23] sm:$0xff] }
  0x16   : > { %247 = vperm.xlu0 %402, %v244_v2  }
  0x80   : > { %v241_v3 = vpop.permute.xlu0 %240 }
  0x81   : > { %v243_v5 = vmul.f32 %v241_v3, %v237_v4 }
  0x88   : > { %v248_v6 = vpop.permute.xlu0 %247 }
  0x89   : > { %v250_v7 = vadd.f32 %v248_v6, %v243_v5 }
  0x8b   : > { %251 = vst [vmem:[%s235_s26] sm:$0xff] %v250_v7 }
  0x8c PF: > { %s13_s14 = sadd.s32 1, %s425_s14   ;;  %s484_s12 = smov %s421_s13 }
  0x8d   : > { %p10_p5 = scmp.ge.s32.totalorder %s13_s14, 4   ;;  %s485_s13 = smov %s487_s15 }
  0x8f   :  { %12 = sbr.rel (!%p10_p5) target bundleno = 2 (0x2), region = 68 }

</bundles_post_ra>
